<compile_context>
chip_gen: v7x
topology: tpu7x:2x2x1
jax: 0.10.0
libtpu: 0.0.40
codegen_flags: <defaults>
</compile_context>

<pallas_src>
import functools

import jax
import jax.numpy as jnp
from jax.experimental import pallas as pl
from jax.experimental.pallas import tpu as pltpu


D_IN, D_H1, D_H2, D_OUT = 8, 6, 4, 1
_SIGMOIDS_PER_ELEM = D_H1 + D_H2 + D_OUT                              # 11
_FLOPS_PER_ELEM = (2 * (D_IN * D_H1 + D_H1 * D_H2 + D_H2 * D_OUT)
                   + _SIGMOIDS_PER_ELEM)                              # ~163


def _round_up(x, m):
    return (x + m - 1) // m * m


def _unrolled_layer(rows, w_ref, b_ref, n_out, n_in):
    """One Linear+sigmoid layer, fully unrolled as VPU FMAs.

    rows  : list of n_in lane-dense (1, BT) f32 vectors
    w_ref : (n_out, n_in) f32 in SMEM (PyTorch [out, in] layout)
    b_ref : (1, n_out)    f32 in SMEM
    returns list of n_out (1, BT) vectors, sigmoid applied.
    """
    outs = []
    for o in range(n_out):
        z = b_ref[0, o] + w_ref[o, 0] * rows[0]        # bias folded into 1st FMA
        for k in range(1, n_in):
            z = z + w_ref[o, k] * rows[k]
        outs.append(jax.nn.sigmoid(z))
    return outs


def _mlp_kernel(x_ref, w1_ref, b1_ref, w2_ref, b2_ref, w3_ref, b3_ref, o_ref):
    # x_ref: (8, BT) feature-major tile (lane axis = batch, multiple of 128).
    x_rows = [x_ref[k:k + 1, :] for k in range(D_IN)]   # 8 x (1, BT)
    h1 = _unrolled_layer(x_rows, w1_ref, b1_ref, D_H1, D_IN)
    h2 = _unrolled_layer(h1, w2_ref, b2_ref, D_H2, D_H1)
    h3 = _unrolled_layer(h2, w3_ref, b3_ref, D_OUT, D_H2)
    o_ref[...] = h3[0]                                  # (1, BT), lane-dense


@functools.partial(jax.jit, static_argnames=("block_batch",))
def wide_deep_forward(x, params, block_batch=32768):
    """x: [B, 8] float32; params: w1/w2/w3 as [out,in], b1/b2/b3 as [1,out]."""
    w1, b1 = params["w1"], params["b1"]
    w2, b2 = params["w2"], params["b2"]
    w3, b3 = params["w3"], params["b3"]

    B = x.shape[0]
    # Lane-dense batch tile; 8*BT*4B = 1 MiB at BT=32768 -> fits every chip's
    # VMEM (incl. v7x 64 MiB) with double-buffering headroom.
    BT = min(block_batch, _round_up(B, 128))
    Bp = _round_up(B, BT)

    # Feature-major, zero-padded to a multiple of the batch tile.
    x_t = jnp.pad(x.astype(jnp.float32), ((0, Bp - B), (0, 0))).T     # (8, Bp)

    smem_spec = pl.BlockSpec(memory_space=pltpu.MemorySpace.SMEM)
    weight_bytes = 4 * (w1.size + b1.size + w2.size + b2.size + w3.size + b3.size)
    cost = pl.CostEstimate(
        flops=_FLOPS_PER_ELEM * Bp,
        transcendentals=_SIGMOIDS_PER_ELEM * Bp,
        bytes_accessed=(D_IN + D_OUT) * 4 * Bp + weight_bytes,
    )

    out = pl.pallas_call(
        _mlp_kernel,
        out_shape=jax.ShapeDtypeStruct((D_OUT, Bp), jnp.float32),
        grid=(Bp // BT,),
        in_specs=[
            pl.BlockSpec((D_IN, BT), lambda i: (0, i)),   # batch-tiled input
            smem_spec, smem_spec,                         # w1, b1 (resident)
            smem_spec, smem_spec,                         # w2, b2
            smem_spec, smem_spec,                         # w3, b3
        ],
        out_specs=pl.BlockSpec((D_OUT, BT), lambda i: (0, i)),
        compiler_params=pltpu.CompilerParams(
            dimension_semantics=("parallel",),            # use both TCs on v7x
        ),
        cost_estimate=cost,
    )(x_t, w1, b1, w2, b2, w3, b3)

    return out[0, :B].reshape(B, 1)


def init_params(key):
    """PyTorch nn.Linear-style init; weights stored [out, in], biases [1, out]."""
    ks = jax.random.split(key, 6)

    def lin(kw, kb, fan_in, fan_out):
        bound = 1.0 / jnp.sqrt(fan_in)
        w = jax.random.uniform(kw, (fan_out, fan_in), jnp.float32, -bound, bound)
        b = jax.random.uniform(kb, (1, fan_out), jnp.float32, -bound, bound)
        return w, b

    w1, b1 = lin(ks[0], ks[1], D_IN, D_H1)
    w2, b2 = lin(ks[2], ks[3], D_H1, D_H2)
    w3, b3 = lin(ks[4], ks[5], D_H2, D_OUT)
    return {"w1": w1, "b1": b1, "w2": w2, "b2": b2, "w3": w3, "b3": b3}


def reference_forward(x, p):
    h1 = jax.nn.sigmoid(x @ p["w1"].T + p["b1"])
    h2 = jax.nn.sigmoid(h1 @ p["w2"].T + p["b2"])
    return jax.nn.sigmoid(h2 @ p["w3"].T + p["b3"])


if __name__ == "__main__":
    key = jax.random.PRNGKey(0)
    k_x, k_x2, k_p = jax.random.split(key, 3)
    params = init_params(k_p)

    # Small case matching the original module usage.
    B = 8
    x = jax.random.normal(k_x, (B, 8), dtype=jnp.float32)
    y = wide_deep_forward(x, params)
    jax.block_until_ready(y)
    y_ref = reference_forward(x, params)
    assert y.shape == (B, 1)
    assert jnp.allclose(y, y_ref, atol=1e-5, rtol=1e-5)

    # Ragged batch exercising multiple grid steps + padding path.
    B2 = 300
    x2 = jax.random.normal(k_x2, (B2, 8), dtype=jnp.float32)
    y2 = wide_deep_forward(x2, params, block_batch=128)
    jax.block_until_ready(y2)
    y2_ref = reference_forward(x2, params)
    assert y2.shape == (B2, 1)
    assert jnp.allclose(y2, y2_ref, atol=1e-5, rtol=1e-5)

    print("KERNEL_OK")
</pallas_src>

<mosaic_0001>
module attributes {stable_mosaic.version = 11 : i64} {
  func.func @_mlp_kernel(%arg0: i32, %arg1: memref<8x128xf32, #tpu.memory_space<vmem>>, %arg2: memref<6x8xf32, #tpu.memory_space<smem>>, %arg3: memref<1x6xf32, #tpu.memory_space<smem>>, %arg4: memref<4x6xf32, #tpu.memory_space<smem>>, %arg5: memref<1x4xf32, #tpu.memory_space<smem>>, %arg6: memref<1x4xf32, #tpu.memory_space<smem>>, %arg7: memref<1x1xf32, #tpu.memory_space<smem>>, %arg8: memref<1x128xf32, #tpu.memory_space<vmem>>) attributes {dimension_semantics = [#tpu.dimension_semantics<parallel>], iteration_bounds = array<i64: 1>, scalar_prefetch = 0 : i64, scratch_operands = 0 : i64, tpu.core_type = #tpu.core_type<tc>, window_params = [{transform_indices = @transform_0, window_bounds = array<i64: 8, 128>}, {transform_indices = @transform_1, window_bounds = array<i64: 6, 8>}, {transform_indices = @transform_2, window_bounds = array<i64: 1, 6>}, {transform_indices = @transform_3, window_bounds = array<i64: 4, 6>}, {transform_indices = @transform_4, window_bounds = array<i64: 1, 4>}, {transform_indices = @transform_5, window_bounds = array<i64: 1, 4>}, {transform_indices = @transform_6, window_bounds = array<i64: 1, 1>}, {transform_indices = @transform_7, window_bounds = array<i64: 1, 128>}]} {
    %c0 = arith.constant 0 : index
    %c0_0 = arith.constant 0 : index
    %0 = vector.load %arg1[%c0, %c0_0] : memref<8x128xf32, #tpu.memory_space<vmem>>, vector<1x128xf32>
    %c1 = arith.constant 1 : index
    %c0_1 = arith.constant 0 : index
    %1 = vector.load %arg1[%c1, %c0_1] : memref<8x128xf32, #tpu.memory_space<vmem>>, vector<1x128xf32>
    %c2 = arith.constant 2 : index
    %c0_2 = arith.constant 0 : index
    %2 = vector.load %arg1[%c2, %c0_2] : memref<8x128xf32, #tpu.memory_space<vmem>>, vector<1x128xf32>
    %c3 = arith.constant 3 : index
    %c0_3 = arith.constant 0 : index
    %3 = vector.load %arg1[%c3, %c0_3] : memref<8x128xf32, #tpu.memory_space<vmem>>, vector<1x128xf32>
    %c4 = arith.constant 4 : index
    %c0_4 = arith.constant 0 : index
    %4 = vector.load %arg1[%c4, %c0_4] : memref<8x128xf32, #tpu.memory_space<vmem>>, vector<1x128xf32>
    %c5 = arith.constant 5 : index
    %c0_5 = arith.constant 0 : index
    %5 = vector.load %arg1[%c5, %c0_5] : memref<8x128xf32, #tpu.memory_space<vmem>>, vector<1x128xf32>
    %c6 = arith.constant 6 : index
    %c0_6 = arith.constant 0 : index
    %6 = vector.load %arg1[%c6, %c0_6] : memref<8x128xf32, #tpu.memory_space<vmem>>, vector<1x128xf32>
    %c7 = arith.constant 7 : index
    %c0_7 = arith.constant 0 : index
    %7 = vector.load %arg1[%c7, %c0_7] : memref<8x128xf32, #tpu.memory_space<vmem>>, vector<1x128xf32>
    %c0_8 = arith.constant 0 : index
    %c0_9 = arith.constant 0 : index
    %8 = memref.load %arg3[%c0_8, %c0_9] : memref<1x6xf32, #tpu.memory_space<smem>>
    %c0_10 = arith.constant 0 : index
    %c0_11 = arith.constant 0 : index
    %9 = memref.load %arg2[%c0_10, %c0_11] : memref<6x8xf32, #tpu.memory_space<smem>>
    %10 = vector.broadcast %9 : f32 to vector<1x128xf32>
    %11 = arith.mulf %10, %0 : vector<1x128xf32>
    %12 = vector.broadcast %8 : f32 to vector<1x128xf32>
    %13 = arith.addf %12, %11 : vector<1x128xf32>
    %c0_12 = arith.constant 0 : index
    %c1_13 = arith.constant 1 : index
    %14 = memref.load %arg2[%c0_12, %c1_13] : memref<6x8xf32, #tpu.memory_space<smem>>
    %15 = vector.broadcast %14 : f32 to vector<1x128xf32>
    %16 = arith.mulf %15, %1 : vector<1x128xf32>
    %17 = arith.addf %13, %16 : vector<1x128xf32>
    %c0_14 = arith.constant 0 : index
    %c2_15 = arith.constant 2 : index
    %18 = memref.load %arg2[%c0_14, %c2_15] : memref<6x8xf32, #tpu.memory_space<smem>>
    %19 = vector.broadcast %18 : f32 to vector<1x128xf32>
    %20 = arith.mulf %19, %2 : vector<1x128xf32>
    %21 = arith.addf %17, %20 : vector<1x128xf32>
    %c0_16 = arith.constant 0 : index
    %c3_17 = arith.constant 3 : index
    %22 = memref.load %arg2[%c0_16, %c3_17] : memref<6x8xf32, #tpu.memory_space<smem>>
    %23 = vector.broadcast %22 : f32 to vector<1x128xf32>
    %24 = arith.mulf %23, %3 : vector<1x128xf32>
    %25 = arith.addf %21, %24 : vector<1x128xf32>
    %c0_18 = arith.constant 0 : index
    %c4_19 = arith.constant 4 : index
    %26 = memref.load %arg2[%c0_18, %c4_19] : memref<6x8xf32, #tpu.memory_space<smem>>
    %27 = vector.broadcast %26 : f32 to vector<1x128xf32>
    %28 = arith.mulf %27, %4 : vector<1x128xf32>
    %29 = arith.addf %25, %28 : vector<1x128xf32>
    %c0_20 = arith.constant 0 : index
    %c5_21 = arith.constant 5 : index
    %30 = memref.load %arg2[%c0_20, %c5_21] : memref<6x8xf32, #tpu.memory_space<smem>>
    %31 = vector.broadcast %30 : f32 to vector<1x128xf32>
    %32 = arith.mulf %31, %5 : vector<1x128xf32>
    %33 = arith.addf %29, %32 : vector<1x128xf32>
    %c0_22 = arith.constant 0 : index
    %c6_23 = arith.constant 6 : index
    %34 = memref.load %arg2[%c0_22, %c6_23] : memref<6x8xf32, #tpu.memory_space<smem>>
    %35 = vector.broadcast %34 : f32 to vector<1x128xf32>
    %36 = arith.mulf %35, %6 : vector<1x128xf32>
    %37 = arith.addf %33, %36 : vector<1x128xf32>
    %c0_24 = arith.constant 0 : index
    %c7_25 = arith.constant 7 : index
    %38 = memref.load %arg2[%c0_24, %c7_25] : memref<6x8xf32, #tpu.memory_space<smem>>
    %39 = vector.broadcast %38 : f32 to vector<1x128xf32>
    %40 = arith.mulf %39, %7 : vector<1x128xf32>
    %41 = arith.addf %37, %40 : vector<1x128xf32>
    %42 = arith.negf %41 : vector<1x128xf32>
    %43 = math.exp %42 : vector<1x128xf32>
    %cst = arith.constant 1.000000e+00 : f32
    %44 = vector.broadcast %cst : f32 to vector<1x128xf32>
    %45 = arith.addf %44, %43 : vector<1x128xf32>
    %46 = arith.divf %44, %45 : vector<1x128xf32>
    %c0_26 = arith.constant 0 : index
    %c1_27 = arith.constant 1 : index
    %47 = memref.load %arg3[%c0_26, %c1_27] : memref<1x6xf32, #tpu.memory_space<smem>>
    %c1_28 = arith.constant 1 : index
    %c0_29 = arith.constant 0 : index
    %48 = memref.load %arg2[%c1_28, %c0_29] : memref<6x8xf32, #tpu.memory_space<smem>>
    %49 = vector.broadcast %48 : f32 to vector<1x128xf32>
    %50 = arith.mulf %49, %0 : vector<1x128xf32>
    %51 = vector.broadcast %47 : f32 to vector<1x128xf32>
    %52 = arith.addf %51, %50 : vector<1x128xf32>
    %c1_30 = arith.constant 1 : index
    %c1_31 = arith.constant 1 : index
    %53 = memref.load %arg2[%c1_30, %c1_31] : memref<6x8xf32, #tpu.memory_space<smem>>
    %54 = vector.broadcast %53 : f32 to vector<1x128xf32>
    %55 = arith.mulf %54, %1 : vector<1x128xf32>
    %56 = arith.addf %52, %55 : vector<1x128xf32>
    %c1_32 = arith.constant 1 : index
    %c2_33 = arith.constant 2 : index
    %57 = memref.load %arg2[%c1_32, %c2_33] : memref<6x8xf32, #tpu.memory_space<smem>>
    %58 = vector.broadcast %57 : f32 to vector<1x128xf32>
    %59 = arith.mulf %58, %2 : vector<1x128xf32>
    %60 = arith.addf %56, %59 : vector<1x128xf32>
    %c1_34 = arith.constant 1 : index
    %c3_35 = arith.constant 3 : index
    %61 = memref.load %arg2[%c1_34, %c3_35] : memref<6x8xf32, #tpu.memory_space<smem>>
    %62 = vector.broadcast %61 : f32 to vector<1x128xf32>
    %63 = arith.mulf %62, %3 : vector<1x128xf32>
    %64 = arith.addf %60, %63 : vector<1x128xf32>
    %c1_36 = arith.constant 1 : index
    %c4_37 = arith.constant 4 : index
    %65 = memref.load %arg2[%c1_36, %c4_37] : memref<6x8xf32, #tpu.memory_space<smem>>
    %66 = vector.broadcast %65 : f32 to vector<1x128xf32>
    %67 = arith.mulf %66, %4 : vector<1x128xf32>
    %68 = arith.addf %64, %67 : vector<1x128xf32>
    %c1_38 = arith.constant 1 : index
    %c5_39 = arith.constant 5 : index
    %69 = memref.load %arg2[%c1_38, %c5_39] : memref<6x8xf32, #tpu.memory_space<smem>>
    %70 = vector.broadcast %69 : f32 to vector<1x128xf32>
    %71 = arith.mulf %70, %5 : vector<1x128xf32>
    %72 = arith.addf %68, %71 : vector<1x128xf32>
    %c1_40 = arith.constant 1 : index
    %c6_41 = arith.constant 6 : index
    %73 = memref.load %arg2[%c1_40, %c6_41] : memref<6x8xf32, #tpu.memory_space<smem>>
    %74 = vector.broadcast %73 : f32 to vector<1x128xf32>
    %75 = arith.mulf %74, %6 : vector<1x128xf32>
    %76 = arith.addf %72, %75 : vector<1x128xf32>
    %c1_42 = arith.constant 1 : index
    %c7_43 = arith.constant 7 : index
    %77 = memref.load %arg2[%c1_42, %c7_43] : memref<6x8xf32, #tpu.memory_space<smem>>
    %78 = vector.broadcast %77 : f32 to vector<1x128xf32>
    %79 = arith.mulf %78, %7 : vector<1x128xf32>
    %80 = arith.addf %76, %79 : vector<1x128xf32>
    %81 = arith.negf %80 : vector<1x128xf32>
    %82 = math.exp %81 : vector<1x128xf32>
    %cst_44 = arith.constant 1.000000e+00 : f32
    %83 = vector.broadcast %cst_44 : f32 to vector<1x128xf32>
    %84 = arith.addf %83, %82 : vector<1x128xf32>
    %85 = arith.divf %83, %84 : vector<1x128xf32>
    %c0_45 = arith.constant 0 : index
    %c2_46 = arith.constant 2 : index
    %86 = memref.load %arg3[%c0_45, %c2_46] : memref<1x6xf32, #tpu.memory_space<smem>>
    %c2_47 = arith.constant 2 : index
    %c0_48 = arith.constant 0 : index
    %87 = memref.load %arg2[%c2_47, %c0_48] : memref<6x8xf32, #tpu.memory_space<smem>>
    %88 = vector.broadcast %87 : f32 to vector<1x128xf32>
    %89 = arith.mulf %88, %0 : vector<1x128xf32>
    %90 = vector.broadcast %86 : f32 to vector<1x128xf32>
    %91 = arith.addf %90, %89 : vector<1x128xf32>
    %c2_49 = arith.constant 2 : index
    %c1_50 = arith.constant 1 : index
    %92 = memref.load %arg2[%c2_49, %c1_50] : memref<6x8xf32, #tpu.memory_space<smem>>
    %93 = vector.broadcast %92 : f32 to vector<1x128xf32>
    %94 = arith.mulf %93, %1 : vector<1x128xf32>
    %95 = arith.addf %91, %94 : vector<1x128xf32>
    %c2_51 = arith.constant 2 : index
    %c2_52 = arith.constant 2 : index
    %96 = memref.load %arg2[%c2_51, %c2_52] : memref<6x8xf32, #tpu.memory_space<smem>>
    %97 = vector.broadcast %96 : f32 to vector<1x128xf32>
    %98 = arith.mulf %97, %2 : vector<1x128xf32>
    %99 = arith.addf %95, %98 : vector<1x128xf32>
    %c2_53 = arith.constant 2 : index
    %c3_54 = arith.constant 3 : index
    %100 = memref.load %arg2[%c2_53, %c3_54] : memref<6x8xf32, #tpu.memory_space<smem>>
    %101 = vector.broadcast %100 : f32 to vector<1x128xf32>
    %102 = arith.mulf %101, %3 : vector<1x128xf32>
    %103 = arith.addf %99, %102 : vector<1x128xf32>
    %c2_55 = arith.constant 2 : index
    %c4_56 = arith.constant 4 : index
    %104 = memref.load %arg2[%c2_55, %c4_56] : memref<6x8xf32, #tpu.memory_space<smem>>
    %105 = vector.broadcast %104 : f32 to vector<1x128xf32>
    %106 = arith.mulf %105, %4 : vector<1x128xf32>
    %107 = arith.addf %103, %106 : vector<1x128xf32>
    %c2_57 = arith.constant 2 : index
    %c5_58 = arith.constant 5 : index
    %108 = memref.load %arg2[%c2_57, %c5_58] : memref<6x8xf32, #tpu.memory_space<smem>>
    %109 = vector.broadcast %108 : f32 to vector<1x128xf32>
    %110 = arith.mulf %109, %5 : vector<1x128xf32>
    %111 = arith.addf %107, %110 : vector<1x128xf32>
    %c2_59 = arith.constant 2 : index
    %c6_60 = arith.constant 6 : index
    %112 = memref.load %arg2[%c2_59, %c6_60] : memref<6x8xf32, #tpu.memory_space<smem>>
    %113 = vector.broadcast %112 : f32 to vector<1x128xf32>
    %114 = arith.mulf %113, %6 : vector<1x128xf32>
    %115 = arith.addf %111, %114 : vector<1x128xf32>
    %c2_61 = arith.constant 2 : index
    %c7_62 = arith.constant 7 : index
    %116 = memref.load %arg2[%c2_61, %c7_62] : memref<6x8xf32, #tpu.memory_space<smem>>
    %117 = vector.broadcast %116 : f32 to vector<1x128xf32>
    %118 = arith.mulf %117, %7 : vector<1x128xf32>
    %119 = arith.addf %115, %118 : vector<1x128xf32>
    %120 = arith.negf %119 : vector<1x128xf32>
    %121 = math.exp %120 : vector<1x128xf32>
    %cst_63 = arith.constant 1.000000e+00 : f32
    %122 = vector.broadcast %cst_63 : f32 to vector<1x128xf32>
    %123 = arith.addf %122, %121 : vector<1x128xf32>
    %124 = arith.divf %122, %123 : vector<1x128xf32>
    %c0_64 = arith.constant 0 : index
    %c3_65 = arith.constant 3 : index
    %125 = memref.load %arg3[%c0_64, %c3_65] : memref<1x6xf32, #tpu.memory_space<smem>>
    %c3_66 = arith.constant 3 : index
    %c0_67 = arith.constant 0 : index
    %126 = memref.load %arg2[%c3_66, %c0_67] : memref<6x8xf32, #tpu.memory_space<smem>>
    %127 = vector.broadcast %126 : f32 to vector<1x128xf32>
    %128 = arith.mulf %127, %0 : vector<1x128xf32>
    %129 = vector.broadcast %125 : f32 to vector<1x128xf32>
    %130 = arith.addf %129, %128 : vector<1x128xf32>
    %c3_68 = arith.constant 3 : index
    %c1_69 = arith.constant 1 : index
    %131 = memref.load %arg2[%c3_68, %c1_69] : memref<6x8xf32, #tpu.memory_space<smem>>
    %132 = vector.broadcast %131 : f32 to vector<1x128xf32>
    %133 = arith.mulf %132, %1 : vector<1x128xf32>
    %134 = arith.addf %130, %133 : vector<1x128xf32>
    %c3_70 = arith.constant 3 : index
    %c2_71 = arith.constant 2 : index
    %135 = memref.load %arg2[%c3_70, %c2_71] : memref<6x8xf32, #tpu.memory_space<smem>>
    %136 = vector.broadcast %135 : f32 to vector<1x128xf32>
    %137 = arith.mulf %136, %2 : vector<1x128xf32>
    %138 = arith.addf %134, %137 : vector<1x128xf32>
    %c3_72 = arith.constant 3 : index
    %c3_73 = arith.constant 3 : index
    %139 = memref.load %arg2[%c3_72, %c3_73] : memref<6x8xf32, #tpu.memory_space<smem>>
    %140 = vector.broadcast %139 : f32 to vector<1x128xf32>
    %141 = arith.mulf %140, %3 : vector<1x128xf32>
    %142 = arith.addf %138, %141 : vector<1x128xf32>
    %c3_74 = arith.constant 3 : index
    %c4_75 = arith.constant 4 : index
    %143 = memref.load %arg2[%c3_74, %c4_75] : memref<6x8xf32, #tpu.memory_space<smem>>
    %144 = vector.broadcast %143 : f32 to vector<1x128xf32>
    %145 = arith.mulf %144, %4 : vector<1x128xf32>
    %146 = arith.addf %142, %145 : vector<1x128xf32>
    %c3_76 = arith.constant 3 : index
    %c5_77 = arith.constant 5 : index
    %147 = memref.load %arg2[%c3_76, %c5_77] : memref<6x8xf32, #tpu.memory_space<smem>>
    %148 = vector.broadcast %147 : f32 to vector<1x128xf32>
    %149 = arith.mulf %148, %5 : vector<1x128xf32>
    %150 = arith.addf %146, %149 : vector<1x128xf32>
    %c3_78 = arith.constant 3 : index
    %c6_79 = arith.constant 6 : index
    %151 = memref.load %arg2[%c3_78, %c6_79] : memref<6x8xf32, #tpu.memory_space<smem>>
    %152 = vector.broadcast %151 : f32 to vector<1x128xf32>
    %153 = arith.mulf %152, %6 : vector<1x128xf32>
    %154 = arith.addf %150, %153 : vector<1x128xf32>
    %c3_80 = arith.constant 3 : index
    %c7_81 = arith.constant 7 : index
    %155 = memref.load %arg2[%c3_80, %c7_81] : memref<6x8xf32, #tpu.memory_space<smem>>
    %156 = vector.broadcast %155 : f32 to vector<1x128xf32>
    %157 = arith.mulf %156, %7 : vector<1x128xf32>
    %158 = arith.addf %154, %157 : vector<1x128xf32>
    %159 = arith.negf %158 : vector<1x128xf32>
    %160 = math.exp %159 : vector<1x128xf32>
    %cst_82 = arith.constant 1.000000e+00 : f32
    %161 = vector.broadcast %cst_82 : f32 to vector<1x128xf32>
    %162 = arith.addf %161, %160 : vector<1x128xf32>
    %163 = arith.divf %161, %162 : vector<1x128xf32>
    %c0_83 = arith.constant 0 : index
    %c4_84 = arith.constant 4 : index
    %164 = memref.load %arg3[%c0_83, %c4_84] : memref<1x6xf32, #tpu.memory_space<smem>>
    %c4_85 = arith.constant 4 : index
    %c0_86 = arith.constant 0 : index
    %165 = memref.load %arg2[%c4_85, %c0_86] : memref<6x8xf32, #tpu.memory_space<smem>>
    %166 = vector.broadcast %165 : f32 to vector<1x128xf32>
    %167 = arith.mulf %166, %0 : vector<1x128xf32>
    %168 = vector.broadcast %164 : f32 to vector<1x128xf32>
    %169 = arith.addf %168, %167 : vector<1x128xf32>
    %c4_87 = arith.constant 4 : index
    %c1_88 = arith.constant 1 : index
    %170 = memref.load %arg2[%c4_87, %c1_88] : memref<6x8xf32, #tpu.memory_space<smem>>
    %171 = vector.broadcast %170 : f32 to vector<1x128xf32>
    %172 = arith.mulf %171, %1 : vector<1x128xf32>
    %173 = arith.addf %169, %172 : vector<1x128xf32>
    %c4_89 = arith.constant 4 : index
    %c2_90 = arith.constant 2 : index
    %174 = memref.load %arg2[%c4_89, %c2_90] : memref<6x8xf32, #tpu.memory_space<smem>>
    %175 = vector.broadcast %174 : f32 to vector<1x128xf32>
    %176 = arith.mulf %175, %2 : vector<1x128xf32>
    %177 = arith.addf %173, %176 : vector<1x128xf32>
    %c4_91 = arith.constant 4 : index
    %c3_92 = arith.constant 3 : index
    %178 = memref.load %arg2[%c4_91, %c3_92] : memref<6x8xf32, #tpu.memory_space<smem>>
    %179 = vector.broadcast %178 : f32 to vector<1x128xf32>
    %180 = arith.mulf %179, %3 : vector<1x128xf32>
    %181 = arith.addf %177, %180 : vector<1x128xf32>
    %c4_93 = arith.constant 4 : index
    %c4_94 = arith.constant 4 : index
    %182 = memref.load %arg2[%c4_93, %c4_94] : memref<6x8xf32, #tpu.memory_space<smem>>
    %183 = vector.broadcast %182 : f32 to vector<1x128xf32>
    %184 = arith.mulf %183, %4 : vector<1x128xf32>
    %185 = arith.addf %181, %184 : vector<1x128xf32>
    %c4_95 = arith.constant 4 : index
    %c5_96 = arith.constant 5 : index
    %186 = memref.load %arg2[%c4_95, %c5_96] : memref<6x8xf32, #tpu.memory_space<smem>>
    %187 = vector.broadcast %186 : f32 to vector<1x128xf32>
    %188 = arith.mulf %187, %5 : vector<1x128xf32>
    %189 = arith.addf %185, %188 : vector<1x128xf32>
    %c4_97 = arith.constant 4 : index
    %c6_98 = arith.constant 6 : index
    %190 = memref.load %arg2[%c4_97, %c6_98] : memref<6x8xf32, #tpu.memory_space<smem>>
    %191 = vector.broadcast %190 : f32 to vector<1x128xf32>
    %192 = arith.mulf %191, %6 : vector<1x128xf32>
    %193 = arith.addf %189, %192 : vector<1x128xf32>
    %c4_99 = arith.constant 4 : index
    %c7_100 = arith.constant 7 : index
    %194 = memref.load %arg2[%c4_99, %c7_100] : memref<6x8xf32, #tpu.memory_space<smem>>
    %195 = vector.broadcast %194 : f32 to vector<1x128xf32>
    %196 = arith.mulf %195, %7 : vector<1x128xf32>
    %197 = arith.addf %193, %196 : vector<1x128xf32>
    %198 = arith.negf %197 : vector<1x128xf32>
    %199 = math.exp %198 : vector<1x128xf32>
    %cst_101 = arith.constant 1.000000e+00 : f32
    %200 = vector.broadcast %cst_101 : f32 to vector<1x128xf32>
    %201 = arith.addf %200, %199 : vector<1x128xf32>
    %202 = arith.divf %200, %201 : vector<1x128xf32>
    %c0_102 = arith.constant 0 : index
    %c5_103 = arith.constant 5 : index
    %203 = memref.load %arg3[%c0_102, %c5_103] : memref<1x6xf32, #tpu.memory_space<smem>>
    %c5_104 = arith.constant 5 : index
    %c0_105 = arith.constant 0 : index
    %204 = memref.load %arg2[%c5_104, %c0_105] : memref<6x8xf32, #tpu.memory_space<smem>>
    %205 = vector.broadcast %204 : f32 to vector<1x128xf32>
    %206 = arith.mulf %205, %0 : vector<1x128xf32>
    %207 = vector.broadcast %203 : f32 to vector<1x128xf32>
    %208 = arith.addf %207, %206 : vector<1x128xf32>
    %c5_106 = arith.constant 5 : index
    %c1_107 = arith.constant 1 : index
    %209 = memref.load %arg2[%c5_106, %c1_107] : memref<6x8xf32, #tpu.memory_space<smem>>
    %210 = vector.broadcast %209 : f32 to vector<1x128xf32>
    %211 = arith.mulf %210, %1 : vector<1x128xf32>
    %212 = arith.addf %208, %211 : vector<1x128xf32>
    %c5_108 = arith.constant 5 : index
    %c2_109 = arith.constant 2 : index
    %213 = memref.load %arg2[%c5_108, %c2_109] : memref<6x8xf32, #tpu.memory_space<smem>>
    %214 = vector.broadcast %213 : f32 to vector<1x128xf32>
    %215 = arith.mulf %214, %2 : vector<1x128xf32>
    %216 = arith.addf %212, %215 : vector<1x128xf32>
    %c5_110 = arith.constant 5 : index
    %c3_111 = arith.constant 3 : index
    %217 = memref.load %arg2[%c5_110, %c3_111] : memref<6x8xf32, #tpu.memory_space<smem>>
    %218 = vector.broadcast %217 : f32 to vector<1x128xf32>
    %219 = arith.mulf %218, %3 : vector<1x128xf32>
    %220 = arith.addf %216, %219 : vector<1x128xf32>
    %c5_112 = arith.constant 5 : index
    %c4_113 = arith.constant 4 : index
    %221 = memref.load %arg2[%c5_112, %c4_113] : memref<6x8xf32, #tpu.memory_space<smem>>
    %222 = vector.broadcast %221 : f32 to vector<1x128xf32>
    %223 = arith.mulf %222, %4 : vector<1x128xf32>
    %224 = arith.addf %220, %223 : vector<1x128xf32>
    %c5_114 = arith.constant 5 : index
    %c5_115 = arith.constant 5 : index
    %225 = memref.load %arg2[%c5_114, %c5_115] : memref<6x8xf32, #tpu.memory_space<smem>>
    %226 = vector.broadcast %225 : f32 to vector<1x128xf32>
    %227 = arith.mulf %226, %5 : vector<1x128xf32>
    %228 = arith.addf %224, %227 : vector<1x128xf32>
    %c5_116 = arith.constant 5 : index
    %c6_117 = arith.constant 6 : index
    %229 = memref.load %arg2[%c5_116, %c6_117] : memref<6x8xf32, #tpu.memory_space<smem>>
    %230 = vector.broadcast %229 : f32 to vector<1x128xf32>
    %231 = arith.mulf %230, %6 : vector<1x128xf32>
    %232 = arith.addf %228, %231 : vector<1x128xf32>
    %c5_118 = arith.constant 5 : index
    %c7_119 = arith.constant 7 : index
    %233 = memref.load %arg2[%c5_118, %c7_119] : memref<6x8xf32, #tpu.memory_space<smem>>
    %234 = vector.broadcast %233 : f32 to vector<1x128xf32>
    %235 = arith.mulf %234, %7 : vector<1x128xf32>
    %236 = arith.addf %232, %235 : vector<1x128xf32>
    %237 = arith.negf %236 : vector<1x128xf32>
    %238 = math.exp %237 : vector<1x128xf32>
    %cst_120 = arith.constant 1.000000e+00 : f32
    %239 = vector.broadcast %cst_120 : f32 to vector<1x128xf32>
    %240 = arith.addf %239, %238 : vector<1x128xf32>
    %241 = arith.divf %239, %240 : vector<1x128xf32>
    %c0_121 = arith.constant 0 : index
    %c0_122 = arith.constant 0 : index
    %242 = memref.load %arg5[%c0_121, %c0_122] : memref<1x4xf32, #tpu.memory_space<smem>>
    %c0_123 = arith.constant 0 : index
    %c0_124 = arith.constant 0 : index
    %243 = memref.load %arg4[%c0_123, %c0_124] : memref<4x6xf32, #tpu.memory_space<smem>>
    %244 = vector.broadcast %243 : f32 to vector<1x128xf32>
    %245 = arith.mulf %244, %46 : vector<1x128xf32>
    %246 = vector.broadcast %242 : f32 to vector<1x128xf32>
    %247 = arith.addf %246, %245 : vector<1x128xf32>
    %c0_125 = arith.constant 0 : index
    %c1_126 = arith.constant 1 : index
    %248 = memref.load %arg4[%c0_125, %c1_126] : memref<4x6xf32, #tpu.memory_space<smem>>
    %249 = vector.broadcast %248 : f32 to vector<1x128xf32>
    %250 = arith.mulf %249, %85 : vector<1x128xf32>
    %251 = arith.addf %247, %250 : vector<1x128xf32>
    %c0_127 = arith.constant 0 : index
    %c2_128 = arith.constant 2 : index
    %252 = memref.load %arg4[%c0_127, %c2_128] : memref<4x6xf32, #tpu.memory_space<smem>>
    %253 = vector.broadcast %252 : f32 to vector<1x128xf32>
    %254 = arith.mulf %253, %124 : vector<1x128xf32>
    %255 = arith.addf %251, %254 : vector<1x128xf32>
    %c0_129 = arith.constant 0 : index
    %c3_130 = arith.constant 3 : index
    %256 = memref.load %arg4[%c0_129, %c3_130] : memref<4x6xf32, #tpu.memory_space<smem>>
    %257 = vector.broadcast %256 : f32 to vector<1x128xf32>
    %258 = arith.mulf %257, %163 : vector<1x128xf32>
    %259 = arith.addf %255, %258 : vector<1x128xf32>
    %c0_131 = arith.constant 0 : index
    %c4_132 = arith.constant 4 : index
    %260 = memref.load %arg4[%c0_131, %c4_132] : memref<4x6xf32, #tpu.memory_space<smem>>
    %261 = vector.broadcast %260 : f32 to vector<1x128xf32>
    %262 = arith.mulf %261, %202 : vector<1x128xf32>
    %263 = arith.addf %259, %262 : vector<1x128xf32>
    %c0_133 = arith.constant 0 : index
    %c5_134 = arith.constant 5 : index
    %264 = memref.load %arg4[%c0_133, %c5_134] : memref<4x6xf32, #tpu.memory_space<smem>>
    %265 = vector.broadcast %264 : f32 to vector<1x128xf32>
    %266 = arith.mulf %265, %241 : vector<1x128xf32>
    %267 = arith.addf %263, %266 : vector<1x128xf32>
    %268 = arith.negf %267 : vector<1x128xf32>
    %269 = math.exp %268 : vector<1x128xf32>
    %cst_135 = arith.constant 1.000000e+00 : f32
    %270 = vector.broadcast %cst_135 : f32 to vector<1x128xf32>
    %271 = arith.addf %270, %269 : vector<1x128xf32>
    %272 = arith.divf %270, %271 : vector<1x128xf32>
    %c0_136 = arith.constant 0 : index
    %c1_137 = arith.constant 1 : index
    %273 = memref.load %arg5[%c0_136, %c1_137] : memref<1x4xf32, #tpu.memory_space<smem>>
    %c1_138 = arith.constant 1 : index
    %c0_139 = arith.constant 0 : index
    %274 = memref.load %arg4[%c1_138, %c0_139] : memref<4x6xf32, #tpu.memory_space<smem>>
    %275 = vector.broadcast %274 : f32 to vector<1x128xf32>
    %276 = arith.mulf %275, %46 : vector<1x128xf32>
    %277 = vector.broadcast %273 : f32 to vector<1x128xf32>
    %278 = arith.addf %277, %276 : vector<1x128xf32>
    %c1_140 = arith.constant 1 : index
    %c1_141 = arith.constant 1 : index
    %279 = memref.load %arg4[%c1_140, %c1_141] : memref<4x6xf32, #tpu.memory_space<smem>>
    %280 = vector.broadcast %279 : f32 to vector<1x128xf32>
    %281 = arith.mulf %280, %85 : vector<1x128xf32>
    %282 = arith.addf %278, %281 : vector<1x128xf32>
    %c1_142 = arith.constant 1 : index
    %c2_143 = arith.constant 2 : index
    %283 = memref.load %arg4[%c1_142, %c2_143] : memref<4x6xf32, #tpu.memory_space<smem>>
    %284 = vector.broadcast %283 : f32 to vector<1x128xf32>
    %285 = arith.mulf %284, %124 : vector<1x128xf32>
    %286 = arith.addf %282, %285 : vector<1x128xf32>
    %c1_144 = arith.constant 1 : index
    %c3_145 = arith.constant 3 : index
    %287 = memref.load %arg4[%c1_144, %c3_145] : memref<4x6xf32, #tpu.memory_space<smem>>
    %288 = vector.broadcast %287 : f32 to vector<1x128xf32>
    %289 = arith.mulf %288, %163 : vector<1x128xf32>
    %290 = arith.addf %286, %289 : vector<1x128xf32>
    %c1_146 = arith.constant 1 : index
    %c4_147 = arith.constant 4 : index
    %291 = memref.load %arg4[%c1_146, %c4_147] : memref<4x6xf32, #tpu.memory_space<smem>>
    %292 = vector.broadcast %291 : f32 to vector<1x128xf32>
    %293 = arith.mulf %292, %202 : vector<1x128xf32>
    %294 = arith.addf %290, %293 : vector<1x128xf32>
    %c1_148 = arith.constant 1 : index
    %c5_149 = arith.constant 5 : index
    %295 = memref.load %arg4[%c1_148, %c5_149] : memref<4x6xf32, #tpu.memory_space<smem>>
    %296 = vector.broadcast %295 : f32 to vector<1x128xf32>
    %297 = arith.mulf %296, %241 : vector<1x128xf32>
    %298 = arith.addf %294, %297 : vector<1x128xf32>
    %299 = arith.negf %298 : vector<1x128xf32>
    %300 = math.exp %299 : vector<1x128xf32>
    %cst_150 = arith.constant 1.000000e+00 : f32
    %301 = vector.broadcast %cst_150 : f32 to vector<1x128xf32>
    %302 = arith.addf %301, %300 : vector<1x128xf32>
    %303 = arith.divf %301, %302 : vector<1x128xf32>
    %c0_151 = arith.constant 0 : index
    %c2_152 = arith.constant 2 : index
    %304 = memref.load %arg5[%c0_151, %c2_152] : memref<1x4xf32, #tpu.memory_space<smem>>
    %c2_153 = arith.constant 2 : index
    %c0_154 = arith.constant 0 : index
    %305 = memref.load %arg4[%c2_153, %c0_154] : memref<4x6xf32, #tpu.memory_space<smem>>
    %306 = vector.broadcast %305 : f32 to vector<1x128xf32>
    %307 = arith.mulf %306, %46 : vector<1x128xf32>
    %308 = vector.broadcast %304 : f32 to vector<1x128xf32>
    %309 = arith.addf %308, %307 : vector<1x128xf32>
    %c2_155 = arith.constant 2 : index
    %c1_156 = arith.constant 1 : index
    %310 = memref.load %arg4[%c2_155, %c1_156] : memref<4x6xf32, #tpu.memory_space<smem>>
    %311 = vector.broadcast %310 : f32 to vector<1x128xf32>
    %312 = arith.mulf %311, %85 : vector<1x128xf32>
    %313 = arith.addf %309, %312 : vector<1x128xf32>
    %c2_157 = arith.constant 2 : index
    %c2_158 = arith.constant 2 : index
    %314 = memref.load %arg4[%c2_157, %c2_158] : memref<4x6xf32, #tpu.memory_space<smem>>
    %315 = vector.broadcast %314 : f32 to vector<1x128xf32>
    %316 = arith.mulf %315, %124 : vector<1x128xf32>
    %317 = arith.addf %313, %316 : vector<1x128xf32>
    %c2_159 = arith.constant 2 : index
    %c3_160 = arith.constant 3 : index
    %318 = memref.load %arg4[%c2_159, %c3_160] : memref<4x6xf32, #tpu.memory_space<smem>>
    %319 = vector.broadcast %318 : f32 to vector<1x128xf32>
    %320 = arith.mulf %319, %163 : vector<1x128xf32>
    %321 = arith.addf %317, %320 : vector<1x128xf32>
    %c2_161 = arith.constant 2 : index
    %c4_162 = arith.constant 4 : index
    %322 = memref.load %arg4[%c2_161, %c4_162] : memref<4x6xf32, #tpu.memory_space<smem>>
    %323 = vector.broadcast %322 : f32 to vector<1x128xf32>
    %324 = arith.mulf %323, %202 : vector<1x128xf32>
    %325 = arith.addf %321, %324 : vector<1x128xf32>
    %c2_163 = arith.constant 2 : index
    %c5_164 = arith.constant 5 : index
    %326 = memref.load %arg4[%c2_163, %c5_164] : memref<4x6xf32, #tpu.memory_space<smem>>
    %327 = vector.broadcast %326 : f32 to vector<1x128xf32>
    %328 = arith.mulf %327, %241 : vector<1x128xf32>
    %329 = arith.addf %325, %328 : vector<1x128xf32>
    %330 = arith.negf %329 : vector<1x128xf32>
    %331 = math.exp %330 : vector<1x128xf32>
    %cst_165 = arith.constant 1.000000e+00 : f32
    %332 = vector.broadcast %cst_165 : f32 to vector<1x128xf32>
    %333 = arith.addf %332, %331 : vector<1x128xf32>
    %334 = arith.divf %332, %333 : vector<1x128xf32>
    %c0_166 = arith.constant 0 : index
    %c3_167 = arith.constant 3 : index
    %335 = memref.load %arg5[%c0_166, %c3_167] : memref<1x4xf32, #tpu.memory_space<smem>>
    %c3_168 = arith.constant 3 : index
    %c0_169 = arith.constant 0 : index
    %336 = memref.load %arg4[%c3_168, %c0_169] : memref<4x6xf32, #tpu.memory_space<smem>>
    %337 = vector.broadcast %336 : f32 to vector<1x128xf32>
    %338 = arith.mulf %337, %46 : vector<1x128xf32>
    %339 = vector.broadcast %335 : f32 to vector<1x128xf32>
    %340 = arith.addf %339, %338 : vector<1x128xf32>
    %c3_170 = arith.constant 3 : index
    %c1_171 = arith.constant 1 : index
    %341 = memref.load %arg4[%c3_170, %c1_171] : memref<4x6xf32, #tpu.memory_space<smem>>
    %342 = vector.broadcast %341 : f32 to vector<1x128xf32>
    %343 = arith.mulf %342, %85 : vector<1x128xf32>
    %344 = arith.addf %340, %343 : vector<1x128xf32>
    %c3_172 = arith.constant 3 : index
    %c2_173 = arith.constant 2 : index
    %345 = memref.load %arg4[%c3_172, %c2_173] : memref<4x6xf32, #tpu.memory_space<smem>>
    %346 = vector.broadcast %345 : f32 to vector<1x128xf32>
    %347 = arith.mulf %346, %124 : vector<1x128xf32>
    %348 = arith.addf %344, %347 : vector<1x128xf32>
    %c3_174 = arith.constant 3 : index
    %c3_175 = arith.constant 3 : index
    %349 = memref.load %arg4[%c3_174, %c3_175] : memref<4x6xf32, #tpu.memory_space<smem>>
    %350 = vector.broadcast %349 : f32 to vector<1x128xf32>
    %351 = arith.mulf %350, %163 : vector<1x128xf32>
    %352 = arith.addf %348, %351 : vector<1x128xf32>
    %c3_176 = arith.constant 3 : index
    %c4_177 = arith.constant 4 : index
    %353 = memref.load %arg4[%c3_176, %c4_177] : memref<4x6xf32, #tpu.memory_space<smem>>
    %354 = vector.broadcast %353 : f32 to vector<1x128xf32>
    %355 = arith.mulf %354, %202 : vector<1x128xf32>
    %356 = arith.addf %352, %355 : vector<1x128xf32>
    %c3_178 = arith.constant 3 : index
    %c5_179 = arith.constant 5 : index
    %357 = memref.load %arg4[%c3_178, %c5_179] : memref<4x6xf32, #tpu.memory_space<smem>>
    %358 = vector.broadcast %357 : f32 to vector<1x128xf32>
    %359 = arith.mulf %358, %241 : vector<1x128xf32>
    %360 = arith.addf %356, %359 : vector<1x128xf32>
    %361 = arith.negf %360 : vector<1x128xf32>
    %362 = math.exp %361 : vector<1x128xf32>
    %cst_180 = arith.constant 1.000000e+00 : f32
    %363 = vector.broadcast %cst_180 : f32 to vector<1x128xf32>
    %364 = arith.addf %363, %362 : vector<1x128xf32>
    %365 = arith.divf %363, %364 : vector<1x128xf32>
    %c0_181 = arith.constant 0 : index
    %c0_182 = arith.constant 0 : index
    %366 = memref.load %arg7[%c0_181, %c0_182] : memref<1x1xf32, #tpu.memory_space<smem>>
    %c0_183 = arith.constant 0 : index
    %c0_184 = arith.constant 0 : index
    %367 = memref.load %arg6[%c0_183, %c0_184] : memref<1x4xf32, #tpu.memory_space<smem>>
    %368 = vector.broadcast %367 : f32 to vector<1x128xf32>
    %369 = arith.mulf %368, %272 : vector<1x128xf32>
    %370 = vector.broadcast %366 : f32 to vector<1x128xf32>
    %371 = arith.addf %370, %369 : vector<1x128xf32>
    %c0_185 = arith.constant 0 : index
    %c1_186 = arith.constant 1 : index
    %372 = memref.load %arg6[%c0_185, %c1_186] : memref<1x4xf32, #tpu.memory_space<smem>>
    %373 = vector.broadcast %372 : f32 to vector<1x128xf32>
    %374 = arith.mulf %373, %303 : vector<1x128xf32>
    %375 = arith.addf %371, %374 : vector<1x128xf32>
    %c0_187 = arith.constant 0 : index
    %c2_188 = arith.constant 2 : index
    %376 = memref.load %arg6[%c0_187, %c2_188] : memref<1x4xf32, #tpu.memory_space<smem>>
    %377 = vector.broadcast %376 : f32 to vector<1x128xf32>
    %378 = arith.mulf %377, %334 : vector<1x128xf32>
    %379 = arith.addf %375, %378 : vector<1x128xf32>
    %c0_189 = arith.constant 0 : index
    %c3_190 = arith.constant 3 : index
    %380 = memref.load %arg6[%c0_189, %c3_190] : memref<1x4xf32, #tpu.memory_space<smem>>
    %381 = vector.broadcast %380 : f32 to vector<1x128xf32>
    %382 = arith.mulf %381, %365 : vector<1x128xf32>
    %383 = arith.addf %379, %382 : vector<1x128xf32>
    %384 = arith.negf %383 : vector<1x128xf32>
    %385 = math.exp %384 : vector<1x128xf32>
    %cst_191 = arith.constant 1.000000e+00 : f32
    %386 = vector.broadcast %cst_191 : f32 to vector<1x128xf32>
    %387 = arith.addf %386, %385 : vector<1x128xf32>
    %388 = arith.divf %386, %387 : vector<1x128xf32>
    %c0_192 = arith.constant 0 : index
    %c0_193 = arith.constant 0 : index
    %389 = vector.load %arg8[%c0_192, %c0_193] : memref<1x128xf32, #tpu.memory_space<vmem>>, vector<1x128xf32>
    tpu.vector_store %arg8[%c0_192, %c0_193], %388 {strides = array<i32>} : memref<1x128xf32, #tpu.memory_space<vmem>>, vector<1x128xf32>,
    return
  }
  func.func @transform_0(%arg0: i32) -> (i32, i32) {
    %c0_i32 = arith.constant 0 : i32
    %c0_i32_0 = arith.constant 0 : i32
    return %c0_i32, %arg0 : i32, i32
  }
  func.func @transform_1(%arg0: i32) -> (i32, i32) {
    %c0_i32 = arith.constant 0 : i32
    %c0_i32_0 = arith.constant 0 : i32
    %c0_i32_1 = arith.constant 0 : i32
    return %c0_i32, %c0_i32_0 : i32, i32
  }
  func.func @transform_2(%arg0: i32) -> (i32, i32) {
    %c0_i32 = arith.constant 0 : i32
    %c0_i32_0 = arith.constant 0 : i32
    %c0_i32_1 = arith.constant 0 : i32
    return %c0_i32, %c0_i32_0 : i32, i32
  }
  func.func @transform_3(%arg0: i32) -> (i32, i32) {
    %c0_i32 = arith.constant 0 : i32
    %c0_i32_0 = arith.constant 0 : i32
    %c0_i32_1 = arith.constant 0 : i32
    return %c0_i32, %c0_i32_0 : i32, i32
  }
  func.func @transform_4(%arg0: i32) -> (i32, i32) {
    %c0_i32 = arith.constant 0 : i32
    %c0_i32_0 = arith.constant 0 : i32
    %c0_i32_1 = arith.constant 0 : i32
    return %c0_i32, %c0_i32_0 : i32, i32
  }
  func.func @transform_5(%arg0: i32) -> (i32, i32) {
    %c0_i32 = arith.constant 0 : i32
    %c0_i32_0 = arith.constant 0 : i32
    %c0_i32_1 = arith.constant 0 : i32
    return %c0_i32, %c0_i32_0 : i32, i32
  }
  func.func @transform_6(%arg0: i32) -> (i32, i32) {
    %c0_i32 = arith.constant 0 : i32
    %c0_i32_0 = arith.constant 0 : i32
    %c0_i32_1 = arith.constant 0 : i32
    return %c0_i32, %c0_i32_0 : i32, i32
  }
  func.func @transform_7(%arg0: i32) -> (i32, i32) {
    %c0_i32 = arith.constant 0 : i32
    %c0_i32_0 = arith.constant 0 : i32
    return %c0_i32, %arg0 : i32, i32
  }
}

</mosaic_0001>

<bundles_post_ra>
// kernel: wide_deep_forward.1
= control target key start
LH: loop header
LB: loop body
LE: loop exit
PB: predicated region body
PF: predicated region fallthrough
CT: control target
= control target key end

     0   :  { %13 = vsyncpa [#allocation4], 0  ;;  %s1089_s0 = inlined_call_operand.vmem [shape: f32[8,128], index: 0, kind: input, shape index: {}]   ;;  %s1090_s1 = inlined_call_operand.vmem [shape: f32[6,8], index: 1, kind: input, shape index: {}]   ;;  %s1091_s2 = inlined_call_operand.vmem [shape: f32[1,6], index: 2, kind: input, shape index: {}]   ;;  %s1092_s3 = inlined_call_operand.vmem [shape: f32[4,6], index: 3, kind: input, shape index: {}]   ;;  %s1093_s4 = inlined_call_operand.vmem [shape: f32[1,4], index: 4, kind: input, shape index: {}]   ;;  %s1094_s5 = inlined_call_operand.vmem [shape: f32[1,4], index: 5, kind: input, shape index: {}]   ;;  %s1095_s6 = inlined_call_operand.<no memory space> [shape: f32[1,1], index: 6, kind: input, shape index: {}]   ;;  %s1096_s7 = inlined_call_operand.vmem [shape: f32[1,128], index: 7, kind: output, shape index: {}]  }
   0x1   :  { %14 = vsyncpa [#allocation6], 0  ;;  %s34_s26 = sshll.u32 %s1091_s2, 4  ;;  %s35_s26 = int_to_ptr.vmem [resolvable:$true] %s34_s26 }
   0x2   :  { %15 = vsyncpa [#allocation9], 0  ;;  %s54_s29 = sshll.u32 %s1093_s4, 4  ;;  %s635_s30 = scalar_lea.vmem %s35_s26, 16  ;;  %s55_s29 = int_to_ptr.vmem [resolvable:$true] %s54_s29 }
   0x3   :  { %p636_p0 = scmp.ne.s32.totalorder %s35_s26, %s635_s30  ;;  %p640_p1 = scmp.lt.s32.totalorder %s35_s26, %s35_s26 }
   0x4   :  { %p641_p2 = scmp.lt.s32.totalorder %s635_s30, %s635_s30 }
   0x6   :  { %p642_p3 = por %p641_p2, %p640_p1 }
   0x8   :  { %p643_p4 = pnand %p642_p3, %p636_p0 }
   0xa   :  { %646 = shalt.err (!%p643_p4)
}
   0xb   :  { %s701_s8 = smov [#allocation5]   ;;  %s647_s9 = scalar_lea.vmem %s55_s29, 16 }
   0xc   :  { %37 = dma.vmem_to_smem %s35_s26, 16, %s701_s8, [#allocation6]  }
   0xd   :  { %p648_p5 = scmp.ne.s32.totalorder %s55_s29, %s647_s9  ;;  %p652_p6 = scmp.lt.s32.totalorder %s55_s29, %s55_s29 }
   0xe   :  { %p653_p7 = scmp.lt.s32.totalorder %s647_s9, %s647_s9 }
  0x10   :  { %p654_p8 = por %p653_p7, %p652_p6 }
  0x12   :  { %p655_p9 = pnand %p654_p8, %p648_p5 }
  0x14   :  { %658 = shalt.err (!%p655_p9)
}
  0x15   :  { %s702_s2 = smov [#allocation8]   ;;  %s24_s11 = sshll.u32 %s1090_s1, 4  ;;  %s25_s11 = int_to_ptr.vmem [resolvable:$true] %s24_s11 }
  0x16   :  { %57 = dma.vmem_to_smem %s55_s29, 16, %s702_s2, [#allocation9]  }
  0x17   :  { %s44_s14 = sshll.u32 %s1092_s3, 4  ;;  %s659_s15 = scalar_lea.vmem %s25_s11, 128  ;;  %s45_s14 = int_to_ptr.vmem [resolvable:$true] %s44_s14 }
  0x18   :  { %p660_p10 = scmp.ne.s32.totalorder %s25_s11, %s659_s15  ;;  %p664_p11 = scmp.lt.s32.totalorder %s25_s11, %s25_s11 }
  0x19   :  { %p665_p12 = scmp.lt.s32.totalorder %s659_s15, %s659_s15 }
  0x1b   :  { %p666_p13 = por %p665_p12, %p664_p11 }
  0x1d   :  { %p667_p0 = pnand %p666_p13, %p660_p10 }
  0x1f   :  { %670 = shalt.err (!%p667_p0)
}
  0x20   :  { %s703_s16 = smov [#allocation3]   ;;  %s671_s17 = scalar_lea.vmem %s45_s14, 64 }
  0x21   :  { %27 = dma.vmem_to_smem %s25_s11, 128, %s703_s16, [#allocation4]  }
  0x22   :  { %p672_p1 = scmp.ne.s32.totalorder %s45_s14, %s671_s17  ;;  %p676_p2 = scmp.lt.s32.totalorder %s45_s14, %s45_s14 }
  0x23   :  { %p677_p3 = scmp.lt.s32.totalorder %s671_s17, %s671_s17 }
  0x25   :  { %p678_p4 = por %p677_p3, %p676_p2 }
  0x27   :  { %p679_p5 = pnand %p678_p4, %p672_p1 }
  0x29   :  { %682 = shalt.err (!%p679_p5)
}
  0x2a   :  { %s704_s1 = smov [#allocation7]   ;;  %s64_s19 = sshll.u32 %s1094_s5, 4  ;;  %s65_s19 = int_to_ptr.vmem [resolvable:$true] %s64_s19 }
  0x2b   :  { %47 = dma.vmem_to_smem %s45_s14, 64, %s704_s1, [#allocation6]  }
  0x2c   :  { %s683_s20 = scalar_lea.vmem %s65_s19, 16  ;;  %p688_p7 = scmp.lt.s32.totalorder %s65_s19, %s65_s19 }
  0x2d   :  { %p684_p6 = scmp.ne.s32.totalorder %s65_s19, %s683_s20  ;;  %p689_p8 = scmp.lt.s32.totalorder %s683_s20, %s683_s20 }
  0x2f   :  { %p690_p9 = por %p689_p8, %p688_p7 }
  0x31   :  { %p691_p10 = pnand %p690_p9, %p684_p6 }
  0x33   :  { %694 = shalt.err (!%p691_p10)
}
  0x34   :  { %s705_s21 = smov [#allocation10]  }
  0x35   :  { %67 = dma.vmem_to_smem %s65_s19, 16, %s705_s21, [#allocation9]  }
  0x36   :  { %695 = dma.done.wait [#allocation4], 128  }
  0x37   :  { %696 = vsyncadd [#allocation4], 4294967168 }
  0x38   :  { %697 = dma.done.wait [#allocation6], 80  }
  0x39   :  { %698 = vsyncadd [#allocation6], 4294967216 }
  0x3a   :  { %699 = dma.done.wait [#allocation9], 32  }
  0x3b   :  { %700 = vsyncadd [#allocation9], 4294967264 }
  0x3c   :  { %85 = sfence }
  0x3d   :  { %s761_s22 = sld [smem:[#allocation5]]  ;;  %s494_s23 = sld [smem:[#allocation3 + $0x1]]  ;;  %v770_v0 = vld [vmem:[%s1089_s0] sm:$0x1]  ;;  %v779_v1 = vld [vmem:[%s1089_s0 + $0x1] sm:$0x1] }
  0x3e   :  { %s95_s5 = sld [smem:[#allocation3]]  ;;  %s763_s24 = sld [smem:[#allocation3 + $0x2]]  ;;  %v788_v2 = vld [vmem:[%s1089_s0 + $0x2] sm:$0x1]  ;;  %v797_v3 = vld [vmem:[%s1089_s0 + $0x3] sm:$0x1] }
  0x3f   :  { %s765_s25 = sld [smem:[#allocation3 + $0x3]]  ;;  %s772_s28 = sld [smem:[#allocation3 + $0x4]]  ;;  %v806_v4 = vld [vmem:[%s1089_s0 + $0x4] sm:$0x1]  ;;  %v816_v8 = vld [vmem:[%s1089_s0 + $0x5] sm:$0x1] }
  0x40   :  { %s774_s29 = sld [smem:[#allocation3 + $0x5]]  ;;  %s781_s9 = sld [smem:[#allocation3 + $0x6]]  ;;  %v842_v19 = vld [vmem:[%s1089_s0 + $0x6] sm:$0x1]  ;;  %v855_v24 = vld [vmem:[%s1089_s0 + $0x7] sm:$0x1] }
  0x41   :  { %s783_s2 = sld [smem:[#allocation3 + $0x7]]  ;;  %s790_s11 = sld [smem:[#allocation5 + $0x1]] }
  0x42   :  { %s792_s12 = sld [smem:[#allocation3 + $0x80]]  ;;  %s799_s15 = sld [smem:[#allocation3 + $0x81]] }
  0x43   :  { %s801_s16 = sld [smem:[#allocation3 + $0x82]]  ;;  %v98_v6 = vstv %s761_s22  ;;  %v101_v7 = vstv %s494_s23  ;;  %s809_s3 = sld [smem:[#allocation3 + $0x83]] }
  0x44   :  { %v96_v5 = vstv %s95_s5  ;;  %s811_s18 = sld [smem:[#allocation3 + $0x84]]  ;;  %v102_v10 = vmul.f32 %v101_v7, %v779_v1  ;;  %v105_v11 = vstv %s763_s24  ;;  %s822_s21 = sld [smem:[#allocation3 + $0x85]] }
  0x45   :  { %v97_v9 = vmul.f32 %v96_v5, %v770_v0  ;;  %v109_v12 = vstv %s765_s25  ;;  %s824_s22 = sld [smem:[#allocation3 + $0x86]]  ;;  %v113_v13 = vstv %s772_s28  ;;  %s828_s5 = sld [smem:[#allocation3 + $0x87]]  ;;  %v106_v16 = vmul.f32 %v105_v11, %v788_v2 }
  0x46   :  { %v117_v14 = vstv %s774_s29  ;;  %s830_s23 = sld [smem:[#allocation5 + $0x2]]  ;;  %v110_v17 = vmul.f32 %v109_v12, %v797_v3  ;;  %v114_v18 = vmul.f32 %v113_v13, %v806_v4  ;;  %s835_s24 = sld [smem:[#allocation3 + $0x100]]  ;;  %v121_v21 = vstv %s781_s9 }
  0x47   :  { %v99_v15 = vadd.f32 %v98_v6, %v97_v9  ;;  %s837_s25 = sld [smem:[#allocation3 + $0x101]]  ;;  %v118_v20 = vmul.f32 %v117_v14, %v816_v8  ;;  %v138_v23 = vstv %s790_s11  ;;  %s848_s28 = sld [smem:[#allocation3 + $0x102]]  ;;  %v125_v26 = vstv %s783_s2 }
  0x48   :  { %v136_v22 = vstv %s792_s12  ;;  %s850_s29 = sld [smem:[#allocation3 + $0x103]]  ;;  %v141_v28 = vstv %s799_s15  ;;  %s860_s4 = sld [smem:[#allocation3 + $0x104]]  ;;  %v122_v34 = vmul.f32 %v121_v21, %v842_v19  ;;  %v126_v37 = vmul.f32 %v125_v26, %v855_v24 }
  0x49   :  { %v103_v25 = vadd.f32 %v102_v10, %v99_v15  ;;  %v137_v27 = vmul.f32 %v136_v22, %v770_v0  ;;  %s862_s9 = sld [smem:[#allocation3 + $0x105]]  ;;  %v142_v29 = vmul.f32 %v141_v28, %v779_v1  ;;  %v145_v30 = vstv %s801_s16  ;;  %s868_s10 = sld [smem:[#allocation3 + $0x106]] }
  0x4a   :  { %v149_v31 = vstv %s809_s3  ;;  %v153_v32 = vstv %s811_s18  ;;  %v146_v36 = vmul.f32 %v145_v30, %v788_v2  ;;  %v157_v40 = vstv %s822_s21  ;;  %s876_s0 = sld [smem:[#allocation3 + $0x180]]  ;;  %s878_s2 = sld [smem:[#allocation3 + $0x181]] }
  0x4b   :  { %v107_v33 = vadd.f32 %v106_v16, %v103_v25  ;;  %v139_v35 = vadd.f32 %v138_v23, %v137_v27  ;;  %v150_v38 = vmul.f32 %v149_v31, %v797_v3  ;;  %v154_v39 = vmul.f32 %v153_v32, %v806_v4  ;;  %s882_s11 = sld [smem:[#allocation5 + $0x3]]  ;;  %s888_s12 = sld [smem:[#allocation3 + $0x107]] }
  0x4c   :  { %v161_v43 = vstv %s824_s22  ;;  %v165_v44 = vstv %s828_s5  ;;  %v158_v45 = vmul.f32 %v157_v40, %v816_v8  ;;  %v176_v46 = vstv %s835_s24  ;;  %s890_s13 = sld [smem:[#allocation3 + $0x182]]  ;;  %s894_s14 = sld [smem:[#allocation3 + $0x183]] }
  0x4d   :  { %v111_v41 = vadd.f32 %v110_v17, %v107_v33  ;;  %v143_v42 = vadd.f32 %v142_v29, %v139_v35  ;;  %v178_v47 = vstv %s830_s23  ;;  %v181_v48 = vstv %s837_s25  ;;  %s900_s15 = sld [smem:[#allocation3 + $0x184]]  ;;  %s902_s16 = sld [smem:[#allocation3 + $0x185]] }
  0x4e   :  { %v177_v51 = vmul.f32 %v176_v46, %v770_v0  ;;  %v182_v52 = vmul.f32 %v181_v48, %v779_v1  ;;  %v185_v53 = vstv %s848_s28  ;;  %v189_v54 = vstv %s850_s29  ;;  %s909_s17 = sld [smem:[#allocation3 + $0x186]]  ;;  %s912_s1 = sld [smem:[#allocation3 + $0x187]] }
  0x4f   :  { %v115_v49 = vadd.f32 %v114_v18, %v111_v41  ;;  %v147_v50 = vadd.f32 %v146_v36, %v143_v42  ;;  %v193_v55 = vstv %s860_s4  ;;  %v197_v56 = vstv %s862_s9  ;;  %s914_s3 = sld [smem:[#allocation5 + $0x4]]  ;;  %s920_s18 = sld [smem:[#allocation3 + $0x200]] }
  0x50   :  { %v179_v59 = vadd.f32 %v178_v47, %v177_v51  ;;  %v186_v60 = vmul.f32 %v185_v53, %v788_v2  ;;  %v162_v61 = vmul.f32 %v161_v43, %v842_v19  ;;  %v166_v62 = vmul.f32 %v165_v44, %v855_v24  ;;  %s922_s19 = sld [smem:[#allocation3 + $0x201]]  ;;  %s925_s20 = sld [smem:[#allocation3 + $0x202]] }
  0x51   :  { %v119_v57 = vadd.f32 %v118_v20, %v115_v49  ;;  %v151_v58 = vadd.f32 %v150_v38, %v147_v50  ;;  %v190_v63 = vmul.f32 %v189_v54, %v797_v3  ;;  %v201_v5 = vstv %s868_s10  ;;  %s931_s21 = sld [smem:[#allocation3 + $0x203]]  ;;  %s933_s22 = sld [smem:[#allocation3 + $0x204]] }
  0x52   :  { %v183_v9 = vadd.f32 %v182_v52, %v179_v59  ;;  %v194_v10 = vmul.f32 %v193_v55, %v806_v4  ;;  %v198_v11 = vmul.f32 %v197_v56, %v816_v8  ;;  %v202_v12 = vmul.f32 %v201_v5, %v842_v19  ;;  %s939_s5 = sld [smem:[#allocation3 + $0x205]]  ;;  %s942_s23 = sld [smem:[#allocation3 + $0x206]] }
  0x53   :  { %v123_v6 = vadd.f32 %v122_v34, %v119_v57  ;;  %v155_v7 = vadd.f32 %v154_v39, %v151_v58  ;;  %v216_v13 = vstv %s876_s0  ;;  %v221_v14 = vstv %s878_s2  ;;  %s947_s24 = sld [smem:[#allocation5 + $0x5]]  ;;  %s949_s25 = sld [smem:[#allocation3 + $0x280]] }
  0x54   :  { %v187_v17 = vadd.f32 %v186_v60, %v183_v9  ;;  %v218_v18 = vstv %s882_s11  ;;  %v205_v20 = vstv %s888_s12  ;;  %v217_v21 = vmul.f32 %v216_v13, %v770_v0  ;;  %s956_s26 = sld [smem:[#allocation3 + $0x281]]  ;;  %s958_s27 = sld [smem:[#allocation3 + $0x282]] }
  0x55   :  { %v127_v15 = vadd.f32 %v126_v37, %v123_v6  ;;  %v159_v16 = vadd.f32 %v158_v45, %v155_v7  ;;  %v222_v22 = vmul.f32 %v221_v14, %v779_v1  ;;  %v225_v23 = vstv %s890_s13  ;;  %s962_s28 = sld [smem:[#allocation3 + $0x207]]  ;;  %s967_s29 = sld [smem:[#allocation3 + $0x283]] }
  0x56   :  { %v191_v27 = vadd.f32 %v190_v63, %v187_v17  ;;  %v229_v28 = vstv %s894_s14  ;;  %v219_v29 = vadd.f32 %v218_v18, %v217_v21  ;;  %v226_v30 = vmul.f32 %v225_v23, %v788_v2  ;;  %s969_s30 = sld [smem:[#allocation3 + $0x284]]  ;;  %s975_s8 = sld [smem:[#allocation3 + $0x285]] }
  0x57   :  { %v501_v25 = vmul.f32 -1.442695, %v127_v15  ;;  %v163_v26 = vadd.f32 %v162_v61, %v159_v16  ;;  %v233_v31 = vstv %s900_s15  ;;  %v237_v32 = vstv %s902_s16  ;;  %s982_s4 = sld [smem:[#allocation3 + $0x286]]  ;;  %s988_s9 = sld [smem:[#allocation3 + $0x287]] }
  0x58   :  { %v195_v34 = vadd.f32 %v194_v10, %v191_v27  ;;  %v206_v35 = vmul.f32 %v205_v20, %v855_v24  ;;  %v223_v36 = vadd.f32 %v222_v22, %v219_v29  ;;  %v230_v37 = vmul.f32 %v229_v28, %v797_v3  ;;  %s1001_s10 = sld [smem:[#allocation7]]  ;;  %s1014_s13 = sld [smem:[#allocation7 + $0x1]] }
  0x59   :  { %591 = vpow2.f32 %v501_v25  ;;  %v167_v33 = vadd.f32 %v166_v62, %v163_v26  ;;  %v234_v38 = vmul.f32 %v233_v31, %v806_v4  ;;  %v238_v39 = vmul.f32 %v237_v32, %v816_v8  ;;  %s1004_s0 = sld [smem:[#allocation7 + $0x80]]  ;;  %s1016_s14 = sld [smem:[#allocation8 + $0x1]] }
  0x5a   :  { %v199_v41 = vadd.f32 %v198_v11, %v195_v34  ;;  %v241_v42 = vstv %s909_s17  ;;  %v245_v43 = vstv %s912_s1  ;;  %v227_v44 = vadd.f32 %v226_v30, %v223_v36  ;;  %s1006_s2 = sld [smem:[#allocation7 + $0x100]]  ;;  %s1018_s15 = sld [smem:[#allocation7 + $0x81]] }
  0x5b   :  { %v511_v40 = vmul.f32 -1.442695, %v167_v33  ;;  %v256_v45 = vstv %s920_s18  ;;  %v258_v46 = vstv %s914_s3  ;;  %v261_v47 = vstv %s922_s19  ;;  %s1009_s11 = sld [smem:[#allocation8]]  ;;  %s1021_s16 = sld [smem:[#allocation8 + $0x2]] }
  0x5c   :  { %v203_v48 = vadd.f32 %v202_v12, %v199_v41  ;;  %v257_v49 = vmul.f32 %v256_v45, %v770_v0  ;;  %v262_v50 = vmul.f32 %v261_v47, %v779_v1  ;;  %v231_v51 = vadd.f32 %v230_v37, %v227_v44  ;;  %s1011_s12 = sld [smem:[#allocation7 + $0x180]]  ;;  %s1023_s17 = sld [smem:[#allocation7 + $0x101]] }
  0x5d   :  { %593 = vpow2.f32 %v511_v40  ;;  %v265_v52 = vstv %s925_s20  ;;  %v269_v53 = vstv %s931_s21  ;;  %v273_v54 = vstv %s933_s22  ;;  %s1025_s1 = sld [smem:[#allocation8 + $0x3]]  ;;  %s1027_s3 = sld [smem:[#allocation7 + $0x181]] }
  0x5e   :  { %v207_v55 = vadd.f32 %v206_v35, %v203_v48  ;;  %v259_v56 = vadd.f32 %v258_v46, %v257_v49  ;;  %v266_v57 = vmul.f32 %v265_v52, %v788_v2  ;;  %v235_v58 = vadd.f32 %v234_v38, %v231_v51  ;;  %s1030_s18 = sld [smem:[#allocation7 + $0x2]]  ;;  %s1047_s22 = sld [smem:[#allocation7 + $0x3]] }
  0x5f   :  { %v242_v59 = vmul.f32 %v241_v42, %v842_v19  ;;  %v246_v60 = vmul.f32 %v245_v43, %v855_v24  ;;  %v277_v61 = vstv %s939_s5  ;;  %v270_v5 = vmul.f32 %v269_v53, %v797_v3  ;;  %s1033_s19 = sld [smem:[#allocation7 + $0x82]]  ;;  %s1049_s5 = sld [smem:[#allocation7 + $0x83]] }
  0x60   :  { %v521_v62 = vmul.f32 -1.442695, %v207_v55  ;;  %v263_v63 = vadd.f32 %v262_v50, %v259_v56  ;;  %v274_v6 = vmul.f32 %v273_v54, %v806_v4  ;;  %v239_v7 = vadd.f32 %v238_v39, %v235_v58  ;;  %s1037_s20 = sld [smem:[#allocation7 + $0x102]] }
  0x61   :  { %v281_v9 = vstv %s942_s23  ;;  %v296_v10 = vstv %s949_s25  ;;  %v298_v11 = vstv %s947_s24  ;;  %v278_v14 = vmul.f32 %v277_v61, %v816_v8  ;;  %s1040_s21 = sld [smem:[#allocation7 + $0x182]]  ;;  %s1053_s23 = sld [smem:[#allocation7 + $0x103]] }
  0x62   :  { %595 = vpow2.f32 %v521_v62  ;;  %v267_v13 = vadd.f32 %v266_v57, %v263_v63  ;;  %v297_v15 = vmul.f32 %v296_v10, %v770_v0  ;;  %v243_v17 = vadd.f32 %v242_v59, %v239_v7  ;;  %s1055_s24 = sld [smem:[#allocation7 + $0x183]]  ;;  %s1061_s25 = sld [smem:[#allocation7 + $0x4]] }
  0x63   :  { %v592_v12 = vpop.eup %591  ;;  %v301_v18 = vstv %s956_s26  ;;  %v305_v20 = vstv %s958_s27  ;;  %v285_v27 = vstv %s962_s28  ;;  %v309_v28 = vstv %s967_s29  ;;  %s1063_s26 = sld [smem:[#allocation7 + $0x84]]  ;;  %s1073_s29 = sld [smem:[#allocation7 + $0x5]] }
  0x64   :  { %v131_v16 = vadd.f32 1.0, %v592_v12  ;;  %v271_v21 = vadd.f32 %v270_v5, %v267_v13  ;;  %v299_v22 = vadd.f32 %v298_v11, %v297_v15  ;;  %v302_v23 = vmul.f32 %v301_v18, %v779_v1  ;;  %s1065_s27 = sld [smem:[#allocation7 + $0x104]] }
  0x65   :  { %v306_v25 = vmul.f32 %v305_v20, %v788_v2  ;;  %v247_v26 = vadd.f32 %v246_v60, %v243_v17  ;;  %v313_v29 = vstv %s969_s30  ;;  %v282_v31 = vmul.f32 %v281_v9, %v842_v19  ;;  %s1067_s28 = sld [smem:[#allocation7 + $0x184]]  ;;  %s1075_s30 = sld [smem:[#allocation7 + $0x85]] }
  0x66   :  { %v275_v0 = vadd.f32 %v274_v6, %v271_v21  ;;  %v303_v32 = vadd.f32 %v302_v23, %v299_v22  ;;  %v310_v33 = vmul.f32 %v309_v28, %v797_v3  ;;  %597 = vrcp.f32 %v131_v16 }
  0x67   :  { %v594_v30 = vpop.eup %593  ;;  %v531_v35 = vmul.f32 -1.442695, %v247_v26  ;;  %v317_v36 = vstv %s975_s8  ;;  %v286_v2 = vmul.f32 %v285_v27, %v855_v24  ;;  %v314_v38 = vmul.f32 %v313_v29, %v806_v4  ;;  %s572_s8 = sld [smem:[#allocation7 + $0x105]] }
  0x68   :  { %v171_v34 = vadd.f32 1.0, %v594_v30  ;;  %v279_v1 = vadd.f32 %v278_v14, %v275_v0  ;;  %v307_v37 = vadd.f32 %v306_v25, %v303_v32  ;;  %v321_v39 = vstv %s982_s4  ;;  %s580_s4 = sld [smem:[#allocation7 + $0x185]] }
  0x69   :  { %599 = vpow2.f32 %v531_v35  ;;  %v318_v42 = vmul.f32 %v317_v36, %v816_v8  ;;  %v325_v3 = vstv %s988_s9  ;;  %v322_v45 = vmul.f32 %v321_v39, %v842_v19  ;;  %s463_s9 = sld [smem:[#allocation10]] }
  0x6a   :  { %v283_v40 = vadd.f32 %v282_v31, %v279_v1  ;;  %v311_v41 = vadd.f32 %v310_v33, %v307_v37  ;;  %601 = vrcp.f32 %v171_v34  ;;  %v326_v48 = vmul.f32 %v325_v3, %v855_v24 }
  0x6b   :  { %v336_v50 = vstv %s1001_s10  ;;  %v368_v24 = vstv %s1004_s0  ;;  %v400_v52 = vstv %s1006_s2  ;;  %v338_v53 = vstv %s1009_s11  ;;  %s582_s10 = sld [smem:[#allocation10 + $0x1]]  ;;  %s583_s0 = sld [smem:[#allocation10 + $0x2]] }
  0x6c   :  { %v596_v43 = vpop.eup %595  ;;  %v287_v4 = vadd.f32 %v286_v2, %v283_v40  ;;  %v315_v44 = vadd.f32 %v314_v38, %v311_v41  ;;  %v432_v54 = vstv %s1011_s12  ;;  %v341_v58 = vstv %s1014_s13  ;;  %s584_s2 = sld [smem:[#allocation10 + $0x3]] }
  0x6d   :  { %v211_v8 = vadd.f32 1.0, %v596_v43  ;;  %v370_v59 = vstv %s1016_s14  ;;  %v373_v63 = vstv %s1018_s15  ;;  %v402_v6 = vstv %s1021_s16 }
  0x6e   :  { %v541_v46 = vmul.f32 -1.442695, %v287_v4  ;;  %v319_v47 = vadd.f32 %v318_v42, %v315_v44  ;;  %v405_v7 = vstv %s1023_s17  ;;  %v434_v10 = vstv %s1025_s1 }
  0x6f   :  { %603 = vrcp.f32 %v211_v8  ;;  %v437_v11 = vstv %s1027_s3  ;;  %v345_v21 = vstv %s1030_s18  ;;  %v377_v26 = vstv %s1033_s19 }
  0x70   :  { %605 = vpow2.f32 %v541_v46  ;;  %v323_v19 = vadd.f32 %v322_v45, %v319_v47  ;;  %v598_v49 = vpop.eup %597  ;;  %v409_v27 = vstv %s1037_s20  ;;  %v441_v28 = vstv %s1040_s21 }
  0x71   :  { %v337_v57 = vmul.f32 %v598_v49, %v336_v50  ;;  %v369_v62 = vmul.f32 %v598_v49, %v368_v24  ;;  %v401_v5 = vmul.f32 %v598_v49, %v400_v52  ;;  %v433_v9 = vmul.f32 %v598_v49, %v432_v54 }
  0x72   :  { %v327_v51 = vadd.f32 %v326_v48, %v323_v19  ;;  %v349_v36 = vstv %s1047_s22  ;;  %v381_v2 = vstv %s1049_s5  ;;  %v413_v37 = vstv %s1053_s23 }
  0x73   :  { %v600_v55 = vpop.eup %599  ;;  %v339_v12 = vadd.f32 %v338_v53, %v337_v57  ;;  %v371_v15 = vadd.f32 %v370_v59, %v369_v62  ;;  %v403_v17 = vadd.f32 %v402_v6, %v401_v5  ;;  %v435_v22 = vadd.f32 %v434_v10, %v433_v9 }
  0x74   :  { %v551_v56 = vmul.f32 -1.442695, %v327_v51  ;;  %v602_v60 = vpop.eup %601  ;;  %v251_v61 = vadd.f32 1.0, %v600_v55  ;;  %v445_v38 = vstv %s1055_s24  ;;  %v353_v46 = vstv %s1061_s25 }
  0x75   :  { %v342_v13 = vmul.f32 %v602_v60, %v341_v58  ;;  %v374_v16 = vmul.f32 %v602_v60, %v373_v63  ;;  %v406_v18 = vmul.f32 %v602_v60, %v405_v7  ;;  %v438_v23 = vmul.f32 %v602_v60, %v437_v11 }
  0x76   :  { %607 = vpow2.f32 %v551_v56  ;;  %v385_v47 = vstv %s1063_s26  ;;  %v417_v48 = vstv %s1065_s27  ;;  %v449_v19 = vstv %s1067_s28 }
  0x77   :  { %609 = vrcp.f32 %v251_v61  ;;  %v343_v29 = vadd.f32 %v342_v13, %v339_v12  ;;  %v375_v0 = vadd.f32 %v374_v16, %v371_v15  ;;  %v407_v31 = vadd.f32 %v406_v18, %v403_v17 }
  0x78   :  { %v439_v34 = vadd.f32 %v438_v23, %v435_v22  ;;  %v357_v57 = vstv %s1073_s29  ;;  %v389_v58 = vstv %s1075_s30  ;;  %v421_v59 = vstv %s572_s8 }
  0x79   :  { %v604_v14 = vpop.eup %603  ;;  %v453_v60 = vstv %s580_s4 }
  0x7a   :  { %v606_v20 = vpop.eup %605  ;;  %v346_v30 = vmul.f32 %v604_v14, %v345_v21  ;;  %v378_v32 = vmul.f32 %v604_v14, %v377_v26  ;;  %v410_v33 = vmul.f32 %v604_v14, %v409_v27  ;;  %v442_v35 = vmul.f32 %v604_v14, %v441_v28 }
  0x7b   :  { %v291_v25 = vadd.f32 1.0, %v606_v20 }
  0x7c   :  { %v347_v41 = vadd.f32 %v346_v30, %v343_v29  ;;  %v379_v3 = vadd.f32 %v378_v32, %v375_v0  ;;  %v411_v43 = vadd.f32 %v410_v33, %v407_v31  ;;  %v443_v4 = vadd.f32 %v442_v35, %v439_v34 }
  0x7d   :  { %611 = vrcp.f32 %v291_v25  ;;  %v464_v30 = vstv %s463_s9  ;;  %v469_v0 = vstv %s582_s10  ;;  %v466_v32 = vstv %s1095_s6 }
  0x7e   :  { %v473_v33 = vstv %s583_s0 }
  0x80   :  { %v608_v1 = vpop.eup %607 }
  0x81   :  { %v610_v39 = vpop.eup %609  ;;  %v331_v40 = vadd.f32 1.0, %v608_v1 }
  0x82   :  { %v350_v42 = vmul.f32 %v610_v39, %v349_v36  ;;  %v382_v44 = vmul.f32 %v610_v39, %v381_v2  ;;  %v414_v45 = vmul.f32 %v610_v39, %v413_v37  ;;  %v446_v8 = vmul.f32 %v610_v39, %v445_v38 }
  0x83   :  { %613 = vrcp.f32 %v331_v40  ;;  %v477_v2 = vstv %s584_s2 }
  0x84   :  { %v351_v50 = vadd.f32 %v350_v42, %v347_v41  ;;  %v383_v51 = vadd.f32 %v382_v44, %v379_v3  ;;  %v415_v24 = vadd.f32 %v414_v45, %v411_v43  ;;  %v447_v52 = vadd.f32 %v446_v8, %v443_v4 }
  0x87   :  { %v612_v49 = vpop.eup %611 }
  0x88   :  { %v354_v53 = vmul.f32 %v612_v49, %v353_v46  ;;  %v386_v54 = vmul.f32 %v612_v49, %v385_v47  ;;  %v418_v55 = vmul.f32 %v612_v49, %v417_v48  ;;  %v450_v56 = vmul.f32 %v612_v49, %v449_v19 }
  0x8a   :  { %v355_v61 = vadd.f32 %v354_v53, %v351_v50  ;;  %v387_v62 = vadd.f32 %v386_v54, %v383_v51  ;;  %v419_v63 = vadd.f32 %v418_v55, %v415_v24  ;;  %v451_v5 = vadd.f32 %v450_v56, %v447_v52 }
  0x8d   :  { %v614_v6 = vpop.eup %613 }
  0x8e   :  { %v358_v7 = vmul.f32 %v614_v6, %v357_v57  ;;  %v390_v9 = vmul.f32 %v614_v6, %v389_v58  ;;  %v422_v10 = vmul.f32 %v614_v6, %v421_v59  ;;  %v454_v11 = vmul.f32 %v614_v6, %v453_v60 }
  0x90   :  { %v359_v12 = vadd.f32 %v358_v7, %v355_v61  ;;  %v391_v13 = vadd.f32 %v390_v9, %v387_v62  ;;  %v423_v14 = vadd.f32 %v422_v10, %v419_v63  ;;  %v455_v15 = vadd.f32 %v454_v11, %v451_v5 }
  0x92   :  { %v557_v16 = vmul.f32 -1.442695, %v359_v12  ;;  %v565_v17 = vmul.f32 -1.442695, %v391_v13  ;;  %v573_v18 = vmul.f32 -1.442695, %v423_v14 }
  0x93   :  { %v581_v20 = vmul.f32 -1.442695, %v455_v15 }
  0x94   :  { %615 = vpow2.f32 %v557_v16 }
  0x95   :  { %617 = vpow2.f32 %v565_v17 }
  0x96   :  { %619 = vpow2.f32 %v573_v18 }
  0x97   :  { %621 = vpow2.f32 %v581_v20 }
  0x9e   :  { %v616_v21 = vpop.eup %615 }
  0x9f   :  { %v618_v22 = vpop.eup %617  ;;  %v363_v23 = vadd.f32 1.0, %v616_v21 }
  0xa0   :  { %v620_v25 = vpop.eup %619  ;;  %v395_v26 = vadd.f32 1.0, %v618_v22 }
  0xa1   :  { %v622_v27 = vpop.eup %621  ;;  %623 = vrcp.f32 %v363_v23  ;;  %v427_v28 = vadd.f32 1.0, %v620_v25 }
  0xa2   :  { %625 = vrcp.f32 %v395_v26  ;;  %v459_v29 = vadd.f32 1.0, %v622_v27 }
  0xa3   :  { %627 = vrcp.f32 %v427_v28 }
  0xa4   :  { %629 = vrcp.f32 %v459_v29 }
  0xab   :  { %v624_v31 = vpop.eup %623 }
  0xac   :  { %v626_v34 = vpop.eup %625  ;;  %v465_v35 = vmul.f32 %v624_v31, %v464_v30 }
  0xad   :  { %v628_v36 = vpop.eup %627  ;;  %v470_v1 = vmul.f32 %v626_v34, %v469_v0 }
  0xae   :  { %v630_v37 = vpop.eup %629  ;;  %v467_v38 = vadd.f32 %v466_v32, %v465_v35  ;;  %v474_v39 = vmul.f32 %v628_v36, %v473_v33 }
  0xaf   :  { %v478_v41 = vmul.f32 %v630_v37, %v477_v2 }
  0xb0   :  { %v471_v40 = vadd.f32 %v470_v1, %v467_v38 }
  0xb2   :  { %v475_v42 = vadd.f32 %v474_v39, %v471_v40 }
  0xb4   :  { %v479_v3 = vadd.f32 %v478_v41, %v475_v42 }
  0xb6   :  { %v585_v43 = vmul.f32 -1.442695, %v479_v3 }
  0xb8   :  { %631 = vpow2.f32 %v585_v43 }
  0xc2   :  { %v632_v4 = vpop.eup %631 }
  0xc3   :  { %v483_v44 = vadd.f32 1.0, %v632_v4 }
  0xc5   :  { %633 = vrcp.f32 %v483_v44 }
  0xcf   :  { %v634_v45 = vpop.eup %633 }
  0xd0   :  { %486 = vst [vmem:[%s1096_s7] sm:$0x1] %v634_v45 }
  0xd1   :  { %491 = vsyncpa [#allocation4], 1 }
  0xd2   :  { %492 = vsyncpa [#allocation6], 1 }
  0xd3   :  { %493 = vsyncpa [#allocation9], 1 }

</bundles_post_ra>
